<compile_context>
chip_gen: v7x
topology: tpu7x:2x2x1
jax: 0.10.0
libtpu: 0.0.40
codegen_flags: <defaults>
</compile_context>

<pallas_src>
import jax
import jax.numpy as jnp
from jax.experimental import pallas as pl
from jax.experimental.pallas import tpu as pltpu

NUM_JOINTS = 16
NUM_FEATS = 2
NUM_CHANNELS = 128                     # small synthetic width (real module default is 1024)
NUM_RES_BLOCKS = 2
BN_EPS = 1e-5

IN_DIM = NUM_JOINTS * NUM_FEATS        # 32 = true K of the pre-layer matmul (no padding)
NUM_LAYERS = 1 + 2 * NUM_RES_BLOCKS    # 5 linear+BN+ReLU layers
MAX_BLOCK_M = 512                      # single tile up to this batch size


# ----------------------------- Pallas kernel ---------------------------------
def _lifter_kernel(jin_ref, w_pre, w10, w11, w20, w21, b_ref, out_ref):
    """Fused pre-layer + 2 residual blocks on one (TM, C) batch tile.

    jin_ref : (TM, IN_DIM) f32    flattened joints (cast to bf16 in-kernel)
    w_pre   : (IN_DIM, C)  bf16   BN-folded pre-layer weight
    w1x/w2x : (C, C)       bf16   BN-folded residual-block weights
    b_ref   : (8, C)       f32    packed BN-folded biases, rows 0..4 used
    out_ref : (TM, C)      f32
    """

    def lin_relu(x_bf16, w_r, row):
        # MXU matmul (bf16 in, f32 accumulate) -> folded bias -> ReLU (f32 VPU)
        h = jnp.dot(x_bf16, w_r[...], preferred_element_type=jnp.float32)
        return jnp.maximum(h + b_ref[row:row + 1, :], 0.0)

    x = lin_relu(jin_ref[...].astype(jnp.bfloat16), w_pre, 0)   # pre layer (TM, C) f32

    # ResBlock 1
    h = lin_relu(x.astype(jnp.bfloat16), w10, 1)
    h = lin_relu(h.astype(jnp.bfloat16), w11, 2)
    x = x + h

    # ResBlock 2
    h = lin_relu(x.astype(jnp.bfloat16), w20, 3)
    h = lin_relu(h.astype(jnp.bfloat16), w21, 4)
    x = x + h

    out_ref[...] = x


# ----------------------------- Parameter setup --------------------------------
def _fold_linear_bn(key, in_dim, out_dim):
    """Deterministic Linear + eval-mode BatchNorm1d, folded into (W', b')."""
    k_w, k_b, k_g, k_be, k_m, k_v = jax.random.split(key, 6)
    w = jax.random.normal(k_w, (in_dim, out_dim), jnp.float32) * 0.05
    b = jax.random.normal(k_b, (out_dim,), jnp.float32) * 0.01
    gamma = 1.0 + 0.1 * jax.random.normal(k_g, (out_dim,), jnp.float32)
    beta = 0.1 * jax.random.normal(k_be, (out_dim,), jnp.float32)
    run_mean = 0.1 * jax.random.normal(k_m, (out_dim,), jnp.float32)
    run_var = 1.0 + 0.1 * jax.random.uniform(k_v, (out_dim,), jnp.float32)
    scale = gamma * jax.lax.rsqrt(run_var + BN_EPS)
    shift = beta - run_mean * scale
    w_fold = w * scale[None, :]            # exact eval-mode BN fold
    b_fold = b * scale + shift
    return w_fold, b_fold


def init_params(key):
    keys = jax.random.split(key, NUM_LAYERS)

    weights = []
    biases = []

    # pre layer: true (IN_DIM, C) weight, no zero-row padding
    w, b = _fold_linear_bn(keys[0], IN_DIM, NUM_CHANNELS)
    weights.append(w.astype(jnp.bfloat16))
    biases.append(b)

    for li in range(1, NUM_LAYERS):
        w, b = _fold_linear_bn(keys[li], NUM_CHANNELS, NUM_CHANNELS)
        weights.append(w.astype(jnp.bfloat16))
        biases.append(b)

    # pack biases into one (8, C) f32 tensor (rows 5..7 are zero padding)
    b_stack = jnp.zeros((8, NUM_CHANNELS), jnp.float32)
    b_stack = b_stack.at[:NUM_LAYERS].set(jnp.stack(biases, axis=0))

    return tuple(weights) + (b_stack,)     # (w_pre, w10, w11, w20, w21, b_stack)


# ----------------------------- Tiling choice -----------------------------------
def _choose_block_m(bs):
    """Largest batch tile: bs itself when small (grid=(1,)), else a divisor <= 512."""
    if bs <= MAX_BLOCK_M:
        return bs
    for tm in (512, 384, 256, 128, 64, 32, 16):
        if bs % tm == 0:
            return tm
    return 256   # fallback: cdiv grid; last tile's OOB rows are masked on writeback


# ----------------------------- Wrapper -----------------------------------------
@jax.jit
def lifter_before_forward(joints_2d, params):
    """Mirrors LifterBefore.forward(joints_2d, root_3d=None) -> (out, joints_in)."""
    bs = joints_2d.shape[0]
    joints_in = joints_2d.reshape(bs, -1)                  # (B, 32) f32, returned as-is

    w_pre, w10, w11, w20, w21, b_stack = params
    C = NUM_CHANNELS

    tm = _choose_block_m(bs)
    num_steps = pl.cdiv(bs, tm)
    grid = (num_steps,)

    # Grid-invariant operands stay VMEM-resident; single-buffer them when the grid
    # actually pipelines (double-buffering them is pure VMEM waste -- matters at the
    # real C=1024 on v7x's 64 MiB VMEM).
    resident_kwargs = dict(pipeline_mode=pl.Buffered(1)) if num_steps > 1 else {}
    w_pre_spec = pl.BlockSpec((IN_DIM, C), lambda i: (0, 0), **resident_kwargs)
    w_spec = pl.BlockSpec((C, C), lambda i: (0, 0), **resident_kwargs)
    b_spec = pl.BlockSpec((8, C), lambda i: (0, 0), **resident_kwargs)

    in_specs = [
        pl.BlockSpec((tm, IN_DIM), lambda i: (i, 0)),      # batch-tiled activations
        w_pre_spec, w_spec, w_spec, w_spec, w_spec,
        b_spec,
    ]
    out_specs = pl.BlockSpec((tm, C), lambda i: (i, 0))

    # Megacore split only pays when each core gets a sizeable tile.
    semantics = ("parallel",) if (num_steps > 1 and tm >= 256) else ("arbitrary",)

    flops = 2 * bs * (IN_DIM * C + 2 * NUM_RES_BLOCKS * C * C)
    bytes_accessed = (
        bs * IN_DIM * 4                                    # f32 input
        + (IN_DIM * C + (NUM_LAYERS - 1) * C * C) * 2      # bf16 weights (counted once)
        + 8 * C * 4                                        # f32 packed biases
        + bs * C * 4                                       # f32 output
    )

    out = pl.pallas_call(
        _lifter_kernel,
        out_shape=jax.ShapeDtypeStruct((bs, C), jnp.float32),
        grid=grid,
        in_specs=in_specs,
        out_specs=out_specs,
        compiler_params=pltpu.CompilerParams(
            dimension_semantics=semantics,
            vmem_limit_bytes=32 * 1024 * 1024,   # raise toward 64 MiB on v5e/v6e at C=1024
        ),
        cost_estimate=pl.CostEstimate(
            flops=flops, transcendentals=0, bytes_accessed=bytes_accessed),
    )(joints_in, w_pre, w10, w11, w20, w21, b_stack)

    return out, joints_in


# ----------------------------- Pure-JAX reference ------------------------------
def _reference(joints_2d, params):
    w_pre, w10, w11, w20, w21, b = params
    bs = joints_2d.shape[0]
    joints_in = joints_2d.reshape(bs, -1)

    def lbr(x, w, row):
        h = jnp.dot(x.astype(jnp.bfloat16), w, preferred_element_type=jnp.float32)
        return jnp.maximum(h + b[row], 0.0)

    x = lbr(joints_in, w_pre, 0)
    h = lbr(x, w10, 1)
    h = lbr(h, w11, 2)
    x = x + h
    h = lbr(x, w20, 3)
    h = lbr(h, w21, 4)
    x = x + h
    return x, joints_in


# ----------------------------- Main --------------------------------------------
if __name__ == "__main__":
    key = jax.random.PRNGKey(0)
    k_param, k_data = jax.random.split(key)

    params = init_params(k_param)
    batch = 128                                         # -> tm=128, grid=(1,)
    joints_2d = jax.random.normal(k_data, (batch, NUM_JOINTS, NUM_FEATS), jnp.float32)

    out, joints_in = lifter_before_forward(joints_2d, params)
    out = jax.block_until_ready(out)
    joints_in = jax.block_until_ready(joints_in)

    ref_out, ref_jin = _reference(joints_2d, params)
    assert out.shape == (batch, NUM_CHANNELS)
    assert joints_in.shape == (batch, NUM_JOINTS * NUM_FEATS)
    assert jnp.allclose(out, ref_out, rtol=1e-2, atol=1e-2), \
        float(jnp.max(jnp.abs(out - ref_out)))
    assert jnp.allclose(joints_in, ref_jin)

    print("KERNEL_OK")
</pallas_src>

<mosaic_0001>
module attributes {stable_mosaic.version = 11 : i64} {
  func.func @_lifter_kernel(%arg0: i32, %arg1: memref<128x32xf32, #tpu.memory_space<vmem>>, %arg2: memref<32x128xbf16, #tpu.memory_space<vmem>>, %arg3: memref<128x128xbf16, #tpu.memory_space<vmem>>, %arg4: memref<128x128xbf16, #tpu.memory_space<vmem>>, %arg5: memref<128x128xbf16, #tpu.memory_space<vmem>>, %arg6: memref<128x128xbf16, #tpu.memory_space<vmem>>, %arg7: memref<8x128xf32, #tpu.memory_space<vmem>>, %arg8: memref<128x128xf32, #tpu.memory_space<vmem>>) attributes {dimension_semantics = [#tpu.dimension_semantics<arbitrary>], iteration_bounds = array<i64: 1>, scalar_prefetch = 0 : i64, scratch_operands = 0 : i64, tpu.core_type = #tpu.core_type<tc>, window_params = [{transform_indices = @transform_0, window_bounds = array<i64: 128, 32>}, {pipeline_mode = #tpu.pipeline_mode<synchronous>, transform_indices = @transform_1, window_bounds = array<i64: 32, 128>}, {pipeline_mode = #tpu.pipeline_mode<synchronous>, transform_indices = @transform_2, window_bounds = array<i64: 128, 128>}, {pipeline_mode = #tpu.pipeline_mode<synchronous>, transform_indices = @transform_3, window_bounds = array<i64: 128, 128>}, {pipeline_mode = #tpu.pipeline_mode<synchronous>, transform_indices = @transform_4, window_bounds = array<i64: 128, 128>}, {pipeline_mode = #tpu.pipeline_mode<synchronous>, transform_indices = @transform_5, window_bounds = array<i64: 128, 128>}, {pipeline_mode = #tpu.pipeline_mode<synchronous>, transform_indices = @transform_6, window_bounds = array<i64: 8, 128>}, {transform_indices = @transform_7, window_bounds = array<i64: 128, 128>}]} {
    %c0 = arith.constant 0 : index
    %c0_0 = arith.constant 0 : index
    %0 = vector.load %arg1[%c0, %c0_0] : memref<128x32xf32, #tpu.memory_space<vmem>>, vector<128x32xf32>
    %1 = arith.truncf %0 : vector<128x32xf32> to vector<128x32xbf16>
    %c0_1 = arith.constant 0 : index
    %c0_2 = arith.constant 0 : index
    %2 = vector.load %arg2[%c0_1, %c0_2] : memref<32x128xbf16, #tpu.memory_space<vmem>>, vector<32x128xbf16>
    %cst = arith.constant dense<0.000000e+00> : vector<128x128xf32>
    %3 = tpu.matmul %1, %2, %cst {dimension_numbers = #tpu.dot_dimension_numbers<[1], [0], [0], [1], [0, 0, 1, 1], [], []>} : vector<128x32xbf16>, vector<32x128xbf16>, vector<128x128xf32> -> vector<128x128xf32>
    %c0_3 = arith.constant 0 : index
    %c0_4 = arith.constant 0 : index
    %4 = vector.load %arg7[%c0_3, %c0_4] : memref<8x128xf32, #tpu.memory_space<vmem>>, vector<1x128xf32>
    %5 = vector.broadcast %4 : vector<1x128xf32> to vector<128x128xf32>
    %6 = arith.addf %3, %5 : vector<128x128xf32>
    %cst_5 = arith.constant 0.000000e+00 : f32
    %7 = vector.broadcast %cst_5 : f32 to vector<128x128xf32>
    %8 = arith.maximumf %6, %7 : vector<128x128xf32>
    %9 = arith.truncf %8 : vector<128x128xf32> to vector<128x128xbf16>
    %c0_6 = arith.constant 0 : index
    %c0_7 = arith.constant 0 : index
    %10 = vector.load %arg3[%c0_6, %c0_7] : memref<128x128xbf16, #tpu.memory_space<vmem>>, vector<128x128xbf16>
    %cst_8 = arith.constant dense<0.000000e+00> : vector<128x128xf32>
    %11 = tpu.matmul %9, %10, %cst_8 {dimension_numbers = #tpu.dot_dimension_numbers<[1], [0], [0], [1], [0, 0, 1, 1], [], []>} : vector<128x128xbf16>, vector<128x128xbf16>, vector<128x128xf32> -> vector<128x128xf32>
    %c1 = arith.constant 1 : index
    %c0_9 = arith.constant 0 : index
    %12 = vector.load %arg7[%c1, %c0_9] : memref<8x128xf32, #tpu.memory_space<vmem>>, vector<1x128xf32>
    %13 = vector.broadcast %12 : vector<1x128xf32> to vector<128x128xf32>
    %14 = arith.addf %11, %13 : vector<128x128xf32>
    %cst_10 = arith.constant 0.000000e+00 : f32
    %15 = vector.broadcast %cst_10 : f32 to vector<128x128xf32>
    %16 = arith.maximumf %14, %15 : vector<128x128xf32>
    %17 = arith.truncf %16 : vector<128x128xf32> to vector<128x128xbf16>
    %c0_11 = arith.constant 0 : index
    %c0_12 = arith.constant 0 : index
    %18 = vector.load %arg4[%c0_11, %c0_12] : memref<128x128xbf16, #tpu.memory_space<vmem>>, vector<128x128xbf16>
    %cst_13 = arith.constant dense<0.000000e+00> : vector<128x128xf32>
    %19 = tpu.matmul %17, %18, %cst_13 {dimension_numbers = #tpu.dot_dimension_numbers<[1], [0], [0], [1], [0, 0, 1, 1], [], []>} : vector<128x128xbf16>, vector<128x128xbf16>, vector<128x128xf32> -> vector<128x128xf32>
    %c2 = arith.constant 2 : index
    %c0_14 = arith.constant 0 : index
    %20 = vector.load %arg7[%c2, %c0_14] : memref<8x128xf32, #tpu.memory_space<vmem>>, vector<1x128xf32>
    %21 = vector.broadcast %20 : vector<1x128xf32> to vector<128x128xf32>
    %22 = arith.addf %19, %21 : vector<128x128xf32>
    %cst_15 = arith.constant 0.000000e+00 : f32
    %23 = vector.broadcast %cst_15 : f32 to vector<128x128xf32>
    %24 = arith.maximumf %22, %23 : vector<128x128xf32>
    %25 = arith.addf %8, %24 : vector<128x128xf32>
    %26 = arith.truncf %25 : vector<128x128xf32> to vector<128x128xbf16>
    %c0_16 = arith.constant 0 : index
    %c0_17 = arith.constant 0 : index
    %27 = vector.load %arg5[%c0_16, %c0_17] : memref<128x128xbf16, #tpu.memory_space<vmem>>, vector<128x128xbf16>
    %cst_18 = arith.constant dense<0.000000e+00> : vector<128x128xf32>
    %28 = tpu.matmul %26, %27, %cst_18 {dimension_numbers = #tpu.dot_dimension_numbers<[1], [0], [0], [1], [0, 0, 1, 1], [], []>} : vector<128x128xbf16>, vector<128x128xbf16>, vector<128x128xf32> -> vector<128x128xf32>
    %c3 = arith.constant 3 : index
    %c0_19 = arith.constant 0 : index
    %29 = vector.load %arg7[%c3, %c0_19] : memref<8x128xf32, #tpu.memory_space<vmem>>, vector<1x128xf32>
    %30 = vector.broadcast %29 : vector<1x128xf32> to vector<128x128xf32>
    %31 = arith.addf %28, %30 : vector<128x128xf32>
    %cst_20 = arith.constant 0.000000e+00 : f32
    %32 = vector.broadcast %cst_20 : f32 to vector<128x128xf32>
    %33 = arith.maximumf %31, %32 : vector<128x128xf32>
    %34 = arith.truncf %33 : vector<128x128xf32> to vector<128x128xbf16>
    %c0_21 = arith.constant 0 : index
    %c0_22 = arith.constant 0 : index
    %35 = vector.load %arg6[%c0_21, %c0_22] : memref<128x128xbf16, #tpu.memory_space<vmem>>, vector<128x128xbf16>
    %cst_23 = arith.constant dense<0.000000e+00> : vector<128x128xf32>
    %36 = tpu.matmul %34, %35, %cst_23 {dimension_numbers = #tpu.dot_dimension_numbers<[1], [0], [0], [1], [0, 0, 1, 1], [], []>} : vector<128x128xbf16>, vector<128x128xbf16>, vector<128x128xf32> -> vector<128x128xf32>
    %c4 = arith.constant 4 : index
    %c0_24 = arith.constant 0 : index
    %37 = vector.load %arg7[%c4, %c0_24] : memref<8x128xf32, #tpu.memory_space<vmem>>, vector<1x128xf32>
    %38 = vector.broadcast %37 : vector<1x128xf32> to vector<128x128xf32>
    %39 = arith.addf %36, %38 : vector<128x128xf32>
    %cst_25 = arith.constant 0.000000e+00 : f32
    %40 = vector.broadcast %cst_25 : f32 to vector<128x128xf32>
    %41 = arith.maximumf %39, %40 : vector<128x128xf32>
    %42 = arith.addf %25, %41 : vector<128x128xf32>
    %c0_26 = arith.constant 0 : index
    %c0_27 = arith.constant 0 : index
    %43 = vector.load %arg8[%c0_26, %c0_27] : memref<128x128xf32, #tpu.memory_space<vmem>>, vector<128x128xf32>
    tpu.vector_store %arg8[%c0_26, %c0_27], %42 {strides = array<i32>} : memref<128x128xf32, #tpu.memory_space<vmem>>, vector<128x128xf32>,
    return
  }
  func.func @transform_0(%arg0: i32) -> (i32, i32) {
    %c0_i32 = arith.constant 0 : i32
    %c0_i32_0 = arith.constant 0 : i32
    return %arg0, %c0_i32 : i32, i32
  }
  func.func @transform_1(%arg0: i32) -> (i32, i32) {
    %c0_i32 = arith.constant 0 : i32
    %c0_i32_0 = arith.constant 0 : i32
    %c0_i32_1 = arith.constant 0 : i32
    return %c0_i32, %c0_i32_0 : i32, i32
  }
  func.func @transform_2(%arg0: i32) -> (i32, i32) {
    %c0_i32 = arith.constant 0 : i32
    %c0_i32_0 = arith.constant 0 : i32
    %c0_i32_1 = arith.constant 0 : i32
    return %c0_i32, %c0_i32_0 : i32, i32
  }
  func.func @transform_3(%arg0: i32) -> (i32, i32) {
    %c0_i32 = arith.constant 0 : i32
    %c0_i32_0 = arith.constant 0 : i32
    %c0_i32_1 = arith.constant 0 : i32
    return %c0_i32, %c0_i32_0 : i32, i32
  }
  func.func @transform_4(%arg0: i32) -> (i32, i32) {
    %c0_i32 = arith.constant 0 : i32
    %c0_i32_0 = arith.constant 0 : i32
    %c0_i32_1 = arith.constant 0 : i32
    return %c0_i32, %c0_i32_0 : i32, i32
  }
  func.func @transform_5(%arg0: i32) -> (i32, i32) {
    %c0_i32 = arith.constant 0 : i32
    %c0_i32_0 = arith.constant 0 : i32
    %c0_i32_1 = arith.constant 0 : i32
    return %c0_i32, %c0_i32_0 : i32, i32
  }
  func.func @transform_6(%arg0: i32) -> (i32, i32) {
    %c0_i32 = arith.constant 0 : i32
    %c0_i32_0 = arith.constant 0 : i32
    %c0_i32_1 = arith.constant 0 : i32
    return %c0_i32, %c0_i32_0 : i32, i32
  }
  func.func @transform_7(%arg0: i32) -> (i32, i32) {
    %c0_i32 = arith.constant 0 : i32
    %c0_i32_0 = arith.constant 0 : i32
    return %arg0, %c0_i32 : i32, i32
  }
}

</mosaic_0001>

<bundles_post_ra>
// kernel: lifter_before_forward.1
= control target key start
LH: loop header
LB: loop body
LE: loop exit
PB: predicated region body
PF: predicated region fallthrough
CT: control target
= control target key end

     0   :  { %12 = vsyncpa [#allocation3], 0  ;;  %s1867_s0 = inlined_call_operand.vmem [shape: f32[128,32], index: 0, kind: input, shape index: {}]   ;;  %s1868_s1 = inlined_call_operand.vmem [shape: bf16[32,128], index: 1, kind: input, shape index: {}]   ;;  %s1869_s2 = inlined_call_operand.vmem [shape: bf16[128,128], index: 2, kind: input, shape index: {}]   ;;  %s1870_s3 = inlined_call_operand.vmem [shape: bf16[128,128], index: 3, kind: input, shape index: {}]   ;;  %s1871_s4 = inlined_call_operand.hbm [shape: bf16[128,128], index: 4, kind: input, shape index: {}]   ;;  %s1872_s5 = inlined_call_operand.hbm [shape: bf16[128,128], index: 5, kind: input, shape index: {}]   ;;  %s1873_s6 = inlined_call_operand.vmem [shape: f32[8,128], index: 6, kind: input, shape index: {}]   ;;  %s1874_s7 = inlined_call_operand.hbm [shape: f32[128,128], index: 7, kind: output, shape index: {}]  }
   0x1   :  { %13 = vsyncpa [#allocation6], 0 }
   0x2   :  { %14 = vsyncpa [#allocation4], 0  ;;  %s1447_s24 = smov [#allocation2]   ;;  %s1375_s28 = scalar_lea.hbm %s1871_s4, 1024 }
   0x3   :  { %s28_s25 = sshll.u32 %s1447_s24, 4  ;;  %p1376_p0 = scmp.ne.s32.totalorder %s1871_s4, %s1375_s28  ;;  %s29_s25 = int_to_ptr.vmem [resolvable:$true] %s28_s25 }
   0x4   :  { %p1379_p1 = scmp.lt.u32.totalorder %s1375_s28, %s1871_s4 }
   0x6   :  { %p1381_p2 = pnand %p1379_p1, %p1376_p0 }
   0x8   :  { %1384 = shalt.err (!%p1381_p2)
}
   0x9   :  { %s1385_s10 = scalar_lea.vmem %s29_s25, 1024  ;;  %p1390_p4 = scmp.lt.s32.totalorder %s29_s25, %s29_s25 }
   0xa   :  { %p1386_p3 = scmp.ne.s32.totalorder %s29_s25, %s1385_s10  ;;  %p1391_p5 = scmp.lt.s32.totalorder %s1385_s10, %s1385_s10 }
   0xc   :  { %p1392_p6 = por %p1391_p5, %p1390_p4 }
   0xe   :  { %p1393_p7 = pnand %p1392_p6, %p1386_p3 }
  0x10   :  { %1396 = shalt.err (!%p1393_p7)
}
  0x11   :  { %s1448_s11 = smov 64   ;;  %s1449_s12 = smov 4  }
  0x12   :  { %34 = dma.hbm_to_vmem [thread:$0]  %s1871_s4, 1024, %s29_s25, [#allocation3], %s1448_s11, %s1448_s11, %s1449_s12  }
  0x13   :  { %s1450_s15 = smov [#allocation5]   ;;  %s1397_s19 = scalar_lea.hbm %s1872_s5, 1024 }
  0x14   :  { %s40_s16 = sshll.u32 %s1450_s15, 4  ;;  %p1398_p8 = scmp.ne.s32.totalorder %s1872_s5, %s1397_s19  ;;  %s41_s16 = int_to_ptr.vmem [resolvable:$true] %s40_s16 }
  0x15   :  { %p1401_p9 = scmp.lt.u32.totalorder %s1397_s19, %s1872_s5 }
  0x17   :  { %p1403_p10 = pnand %p1401_p9, %p1398_p8 }
  0x19   :  { %1406 = shalt.err (!%p1403_p10)
}
  0x1a   :  { %s1407_s24 = scalar_lea.vmem %s41_s16, 1024  ;;  %p1412_p12 = scmp.lt.s32.totalorder %s41_s16, %s41_s16 }
  0x1b   :  { %p1408_p11 = scmp.ne.s32.totalorder %s41_s16, %s1407_s24  ;;  %p1413_p13 = scmp.lt.s32.totalorder %s1407_s24, %s1407_s24 }
  0x1d   :  { %p1414_p0 = por %p1413_p13, %p1412_p12 }
  0x1f   :  { %p1415_p1 = pnand %p1414_p0, %p1408_p11 }
  0x21   :  { %1418 = shalt.err (!%p1415_p1)
}
  0x22   :  { %46 = dma.hbm_to_vmem [thread:$0]  %s1872_s5, 1024, %s41_s16, [#allocation6], %s1448_s11, %s1448_s11, %s1449_s12  }
  0x23   :  { %1441 = dma.done.wait [#allocation3], 1024  }
  0x24   :  { %1442 = vsyncadd [#allocation3], 4294966272 }
  0x25   :  { %1443 = dma.done.wait [#allocation6], 1024  }
  0x26   :  { %1444 = vsyncadd [#allocation6], 4294966272  ;;  %v1341_v0 = vld [vmem:[%s1868_s1] sm:$0xff]   ;;  %v1342_v1 = vld [vmem:[%s1868_s1 + $0x8] sm:$0xff]   ;;  %vm101_vm0 = vcmask 261120  }
  0x27   :  { %1186 = vmatprep.subr.bf16.mxu0 %v1341_v0  ;;  %v56_v2 = vld [vmem:[%s1867_s0] sm:$0xff]  ;;  %v57_v3 = vld [vmem:[%s1867_s0 + $0x8] sm:$0xff]  ;;  %v58_v5 = vld [vmem:[%s1867_s0 + $0x10] sm:$0xff] }
  0x28   :  { %1187 = vmatpush3.bf16.msra.mxu0 %v1341_v0  ;;  %v72_v4 = vpack.c.bf16 %v57_v3, %v56_v2  ;;  %v59_v6 = vld [vmem:[%s1867_s0 + $0x18] sm:$0xff]  ;;  %v60_v7 = vld [vmem:[%s1867_s0 + $0x20] sm:$0xff]  ;;  %v61_v8 = vld [vmem:[%s1867_s0 + $0x28] sm:$0xff] }
  0x29   :  { %1188 = vmatprep.subr.bf16.mxu0 %v1342_v1  ;;  %v73_v9 = vpack.c.bf16 %v59_v6, %v58_v5  ;;  %v74_v10 = vpack.c.bf16 %v61_v8, %v60_v7  ;;  %v1343_v11 = vld [vmem:[%s1869_s2] sm:$0xff]   ;;  %v62_v12 = vld [vmem:[%s1867_s0 + $0x30] sm:$0xff]  ;;  %v63_v13 = vld [vmem:[%s1867_s0 + $0x38] sm:$0xff] }
  0x2a   :  { %1190 = vmatprep.mubr.msk.bf16.mxu0 %vm101_vm0, %v72_v4  ;;  %v1344_v14 = vld [vmem:[%s1869_s2 + $0x8] sm:$0xff]   ;;  %v64_v15 = vld [vmem:[%s1867_s0 + $0x40] sm:$0xff]  ;;  %1206 = vmatprep.subr.bf16.mxu1 %v1343_v11  ;;  %v1345_v17 = vld [vmem:[%s1869_s2 + $0x10] sm:$0xff]   ;;  %v75_v18 = vpack.c.bf16 %v63_v13, %v62_v12 }
  0x2b   :  { %v65_v16 = vld [vmem:[%s1867_s0 + $0x48] sm:$0xff]  ;;  %1207 = vmatpush3.bf16.msra.mxu1 %v1343_v11  ;;  %v1346_v19 = vld [vmem:[%s1869_s2 + $0x18] sm:$0xff]   ;;  %v66_v21 = vld [vmem:[%s1867_s0 + $0x50] sm:$0xff] }
  0x2c   :  { %1189 = vmatpush3.bf16.msra.mxu0 %v1342_v1  ;;  %1208 = vmatprep.subr.bf16.mxu1 %v1344_v14  ;;  %v76_v20 = vpack.c.bf16 %v65_v16, %v64_v15  ;;  %v67_v22 = vld [vmem:[%s1867_s0 + $0x58] sm:$0xff]  ;;  %v68_v23 = vld [vmem:[%s1867_s0 + $0x60] sm:$0xff]  ;;  %v69_v24 = vld [vmem:[%s1867_s0 + $0x68] sm:$0xff] }
  0x2d   :  { %v1347_v25 = vld [vmem:[%s1869_s2 + $0x20] sm:$0xff]   ;;  %v77_v26 = vpack.c.bf16 %v67_v22, %v66_v21  ;;  %v1348_v27 = vld [vmem:[%s1869_s2 + $0x28] sm:$0xff]   ;;  %v78_v28 = vpack.c.bf16 %v69_v24, %v68_v23  ;;  %v70_v29 = vld [vmem:[%s1867_s0 + $0x70] sm:$0xff] }
  0x2e   :  { %v71_v30 = vld [vmem:[%s1867_s0 + $0x78] sm:$0xff]  ;;  %v1349_v32 = vld [vmem:[%s1869_s2 + $0x30] sm:$0xff]   ;;  %v1351_v34 = vld [vmem:[%s1870_s3] sm:$0xff]  }
  0x2f   :  { %1191 = vmatmul.mubr.msk.bf16.vlgmr.msra.gmra.mrb[0].mxu0 %vm101_vm0, %v73_v9  ;;  %1209 = vmatpush3.bf16.msra.mxu1 %v1344_v14  ;;  %v79_v31 = vpack.c.bf16 %v71_v30, %v70_v29  ;;  %v1350_v33 = vld [vmem:[%s1869_s2 + $0x38] sm:$0xff]   ;;  %v1352_v35 = vld [vmem:[%s1870_s3 + $0x8] sm:$0xff]   ;;  %v1353_v36 = vld [vmem:[%s1870_s3 + $0x10] sm:$0xff]  }
  0x30   :  { %1194 = vmatprep.mubr.msk.bf16.mxu0 %vm101_vm0, %v74_v10  ;;  %1210 = vmatprep.subr.bf16.mxu1 %v1345_v17  ;;  %v1354_v37 = vld [vmem:[%s1870_s3 + $0x18] sm:$0xff]   ;;  %v1355_v38 = vld [vmem:[%s1870_s3 + $0x20] sm:$0xff]   ;;  %v1356_v39 = vld [vmem:[%s1870_s3 + $0x28] sm:$0xff]  }
  0x31   :  { %1238 = vmatprep.subr.bf16.mxu0 %v1351_v34  ;;  %v1065_v40 = vld [vmem:[%s1873_s6] ss:$0 sm:$0xff] }
  0x32   :  { %1239 = vmatpush3.bf16.msra.mxu0 %v1351_v34  ;;  %v1358_v34 = vld [vmem:[%s1870_s3 + $0x38] sm:$0xff]  }
  0x33   :  { %1211 = vmatpush3.bf16.msra.mxu1 %v1345_v17  ;;  %1240 = vmatprep.subr.bf16.mxu0 %v1352_v35 }
  0x34   :  { %1212 = vmatprep.subr.bf16.mxu1 %v1346_v19 }
  0x36   :  { %1241 = vmatpush3.bf16.msra.mxu0 %v1352_v35  ;;  %v1359_v35 = vld [vmem:[#allocation2] sm:$0xff]  }
  0x37   :  { %1195 = vmatmul.mubr.msk.bf16.gmra.mrb[4].mxu0 %vm101_vm0, %v75_v18  ;;  %1213 = vmatpush3.bf16.msra.mxu1 %v1346_v19 }
  0x38   :  { %1198 = vmatprep.mubr.msk.bf16.mxu0 %vm101_vm0, %v76_v20  ;;  %1214 = vmatprep.subr.bf16.mxu1 %v1347_v25 }
  0x39   :  { %1242 = vmatprep.subr.bf16.mxu0 %v1353_v36 }
  0x3a   :  { %1243 = vmatpush3.bf16.msra.mxu0 %v1353_v36  ;;  %v1360_v36 = vld [vmem:[#allocation2 + $0x8] sm:$0xff]  }
  0x3b   :  { %1215 = vmatpush3.bf16.msra.mxu1 %v1347_v25  ;;  %1244 = vmatprep.subr.bf16.mxu0 %v1354_v37 }
  0x3c   :  { %1216 = vmatprep.subr.bf16.mxu1 %v1348_v27 }
  0x3e   :  { %1245 = vmatpush3.bf16.msra.mxu0 %v1354_v37  ;;  %v1361_v37 = vld [vmem:[#allocation2 + $0x10] sm:$0xff]  }
  0x3f   :  { %1199 = vmatmul.mubr.msk.bf16.gmra.mrb[8].mxu0 %vm101_vm0, %v77_v26  ;;  %1217 = vmatpush3.bf16.msra.mxu1 %v1348_v27 }
  0x40   :  { %1202 = vmatprep.mubr.msk.bf16.mxu0 %vm101_vm0, %v78_v28  ;;  %1218 = vmatprep.subr.bf16.mxu1 %v1349_v32 }
  0x41   :  { %1246 = vmatprep.subr.bf16.mxu0 %v1355_v38 }
  0x42   :  { %1247 = vmatpush3.bf16.msra.mxu0 %v1355_v38  ;;  %v1362_v38 = vld [vmem:[#allocation2 + $0x18] sm:$0xff]  }
  0x43   :  { %1219 = vmatpush3.bf16.msra.mxu1 %v1349_v32  ;;  %1248 = vmatprep.subr.bf16.mxu0 %v1356_v39 }
  0x44   :  { %1220 = vmatprep.subr.bf16.mxu1 %v1350_v33 }
  0x46   :  { %1249 = vmatpush3.bf16.msra.mxu0 %v1356_v39  ;;  %v1363_v39 = vld [vmem:[#allocation2 + $0x20] sm:$0xff]  }
  0x47   :  { %1203 = vmatmul.mubr.msk.bf16.gmra.mrb[12].mxu0 %vm101_vm0, %v79_v31  ;;  %1221 = vmatpush3.bf16.msra.mxu1 %v1350_v33  ;;  %v1357_v33 = vld [vmem:[%s1870_s3 + $0x30] sm:$0xff]  }
  0x48   :  { %1250 = vmatprep.subr.bf16.mxu0 %v1357_v33  ;;  %1270 = vmatprep.subr.bf16.mxu1 %v1359_v35 }
  0x4a   :  { %1251 = vmatpush3.bf16.msra.mxu0 %v1357_v33 }
  0x4b   :  { %1252 = vmatprep.subr.bf16.mxu0 %v1358_v34 }
  0x4e   :  { %1253 = vmatpush3.bf16.msra.mxu0 %v1358_v34 }
 0x102   :  { %v1192_v41 = vpop.f32.mrb[0].mxu0 }
 0x103   :  { %v160_v42 = vpop.f32.mrb[1].mxu0  ;;  %v1627_v45 = vadd.f32 %v1192_v41, %v1065_v40 }
 0x104   :  { %v1625_v43 = vadd.f32 %v1065_v40, %v160_v42  ;;  %v1193_v44 = vpop.f32.mrb[2].mxu0 }
 0x105   :  { %v1629_v46 = vadd.f32 %v1193_v44, %v1065_v40  ;;  %v163_v47 = vpop.f32.mrb[3].mxu0  ;;  %v225_v52 = vmax.f32 %v1627_v45, 0.0 }
 0x106   :  { %v1631_v48 = vadd.f32 %v1065_v40, %v163_v47  ;;  %v223_v50 = vmax.f32 %v1625_v43, 0.0 }
 0x107   :  { %v226_v49 = vmax.f32 %v1629_v46, 0.0 }
 0x108   :  { %v224_v51 = vmax.f32 %v1631_v48, 0.0 }
 0x109   :  { %v240_v55 = vpack.c.bf16 %v226_v49, %v225_v52 }
 0x10a   :  { %v1196_v53 = vpop.f32.mrb[4].mxu0  ;;  %v239_v54 = vpack.c.bf16 %v224_v51, %v223_v50 }
 0x10b   :  { %v176_v56 = vpop.f32.mrb[5].mxu0  ;;  %v1647_v59 = vadd.f32 %v1196_v53, %v1065_v40 }
 0x10c   :  { %v1645_v57 = vadd.f32 %v1065_v40, %v176_v56  ;;  %v1197_v58 = vpop.f32.mrb[6].mxu0  ;;  %1222 = vmatprep.mubr.bf16.mxu1 %v239_v54 }
 0x10d   :  { %v1649_v60 = vadd.f32 %v1197_v58, %v1065_v40  ;;  %v179_v61 = vpop.f32.mrb[7].mxu0  ;;  %1223 = vmatmul.mubr.bf16.vlgmr.msra.gmra.mrb[0].mxu1 %v240_v55  ;;  %v229_v2 = vmax.f32 %v1647_v59, 0.0 }
 0x10e   :  { %v1651_v62 = vadd.f32 %v1065_v40, %v179_v61  ;;  %v227_v0 = vmax.f32 %v1645_v57, 0.0  ;;  %1271 = vmatpush3.bf16.msra.mxu1 %v1359_v35 }
 0x10f   :  { %v230_v63 = vmax.f32 %v1649_v60, 0.0  ;;  %1272 = vmatprep.subr.bf16.mxu1 %v1360_v36 }
 0x110   :  { %v228_v1 = vmax.f32 %v1651_v62, 0.0 }
 0x111   :  { %v242_v5 = vpack.c.bf16 %v230_v63, %v229_v2 }
 0x112   :  { %v241_v3 = vpack.c.bf16 %v228_v1, %v227_v0  ;;  %v1200_v4 = vpop.f32.mrb[8].mxu0  ;;  %1273 = vmatpush3.bf16.msra.mxu1 %v1360_v36 }
 0x113   :  { %v192_v6 = vpop.f32.mrb[9].mxu0  ;;  %v1667_v9 = vadd.f32 %v1200_v4, %v1065_v40  ;;  %1274 = vmatprep.subr.bf16.mxu1 %v1361_v37 }
 0x114   :  { %v1665_v7 = vadd.f32 %v1065_v40, %v192_v6  ;;  %v1201_v8 = vpop.f32.mrb[10].mxu0  ;;  %1226 = vmatprep.mubr.bf16.mxu1 %v241_v3 }
 0x115   :  { %v1669_v10 = vadd.f32 %v1201_v8, %v1065_v40  ;;  %v195_v11 = vpop.f32.mrb[11].mxu0  ;;  %1227 = vmatmul.mubr.bf16.gmra.mrb[4].mxu1 %v242_v5  ;;  %v233_v16 = vmax.f32 %v1667_v9, 0.0 }
 0x116   :  { %v1671_v12 = vadd.f32 %v1065_v40, %v195_v11  ;;  %v231_v14 = vmax.f32 %v1665_v7, 0.0  ;;  %1275 = vmatpush3.bf16.msra.mxu1 %v1361_v37 }
 0x117   :  { %v234_v13 = vmax.f32 %v1669_v10, 0.0  ;;  %1276 = vmatprep.subr.bf16.mxu1 %v1362_v38 }
 0x118   :  { %v232_v15 = vmax.f32 %v1671_v12, 0.0 }
 0x119   :  { %v244_v19 = vpack.c.bf16 %v234_v13, %v233_v16 }
 0x11a   :  { %v243_v17 = vpack.c.bf16 %v232_v15, %v231_v14  ;;  %v1204_v18 = vpop.f32.mrb[12].mxu0  ;;  %1277 = vmatpush3.bf16.msra.mxu1 %v1362_v38 }
 0x11b   :  { %v208_v20 = vpop.f32.mrb[13].mxu0  ;;  %v1687_v23 = vadd.f32 %v1204_v18, %v1065_v40  ;;  %1278 = vmatprep.subr.bf16.mxu1 %v1363_v39 }
 0x11c   :  { %v1685_v21 = vadd.f32 %v1065_v40, %v208_v20  ;;  %v1205_v22 = vpop.f32.mrb[14].mxu0  ;;  %1230 = vmatprep.mubr.bf16.mxu1 %v243_v17 }
 0x11d   :  { %v1689_v24 = vadd.f32 %v1205_v22, %v1065_v40  ;;  %v211_v25 = vpop.f32.mrb[15].mxu0  ;;  %1231 = vmatmul.mubr.bf16.gmra.mrb[8].mxu1 %v244_v19  ;;  %v237_v30 = vmax.f32 %v1687_v23, 0.0  ;;  %v1094_v23 = vld [vmem:[%s1873_s6 + $0x3] ss:$0 sm:$0xff] }
 0x11e   :  { %v1691_v26 = vadd.f32 %v1065_v40, %v211_v25  ;;  %v235_v28 = vmax.f32 %v1685_v21, 0.0  ;;  %1279 = vmatpush3.bf16.msra.mxu1 %v1363_v39  ;;  %v1076_v40 = vld [vmem:[%s1873_s6 + $0x1] ss:$0 sm:$0xff]  ;;  %v1374_v21 = vld [vmem:[#allocation5 + $0x38] sm:$0xff]  }
 0x11f   :  { %v238_v27 = vmax.f32 %v1689_v24, 0.0 }
 0x120   :  { %v236_v29 = vmax.f32 %v1691_v26, 0.0 }
 0x121   :  { %v246_v32 = vpack.c.bf16 %v238_v27, %v237_v30 }
 0x122   :  { %v245_v31 = vpack.c.bf16 %v236_v29, %v235_v28 }
 0x124   :  { %1234 = vmatprep.mubr.bf16.mxu1 %v245_v31 }
 0x125   :  { %1235 = vmatmul.mubr.bf16.gmra.mrb[12].mxu1 %v246_v32 }
 0x1e0   :  { %v1224_v41 = vpop.f32.mrb[0].mxu1 }
 0x1e1   :  { %v359_v42 = vadd.f32 %v1224_v41, %v1076_v40  ;;  %v350_v44 = vpop.f32.mrb[1].mxu1 }
 0x1e2   :  { %v351_v47 = vadd.f32 %v1076_v40, %v350_v44  ;;  %v1225_v53 = vpop.f32.mrb[2].mxu1 }
 0x1e3   :  { %v362_v54 = vadd.f32 %v1225_v53, %v1076_v40  ;;  %v353_v55 = vpop.f32.mrb[3].mxu1  ;;  %v415_v58 = vmax.f32 %v359_v42, 0.0 }
 0x1e4   :  { %v354_v56 = vadd.f32 %v1076_v40, %v353_v55  ;;  %v413_v3 = vmax.f32 %v351_v47, 0.0 }
 0x1e5   :  { %v416_v61 = vmax.f32 %v362_v54, 0.0 }
 0x1e6   :  { %v414_v4 = vmax.f32 %v354_v56, 0.0 }
 0x1e7   :  { %v430_v5 = vpack.c.bf16 %v416_v61, %v415_v58 }
 0x1e8   :  { %v429_v6 = vpack.c.bf16 %v414_v4, %v413_v3  ;;  %v1228_v8 = vpop.f32.mrb[4].mxu1 }
 0x1e9   :  { %v375_v11 = vadd.f32 %v1228_v8, %v1076_v40  ;;  %v366_v17 = vpop.f32.mrb[5].mxu1 }
 0x1ea   :  { %v367_v18 = vadd.f32 %v1076_v40, %v366_v17  ;;  %v1229_v19 = vpop.f32.mrb[6].mxu1  ;;  %1254 = vmatprep.mubr.bf16.mxu0 %v429_v6 }
 0x1eb   :  { %v378_v20 = vadd.f32 %v1229_v19, %v1076_v40  ;;  %v369_v22 = vpop.f32.mrb[7].mxu1  ;;  %1255 = vmatmul.mubr.bf16.vlgmr.msra.gmra.mrb[16].mxu0 %v430_v5  ;;  %v419_v31 = vmax.f32 %v375_v11, 0.0 }
 0x1ec   :  { %v370_v25 = vadd.f32 %v1076_v40, %v369_v22  ;;  %v417_v33 = vmax.f32 %v367_v18, 0.0 }
 0x1ed   :  { %v420_v32 = vmax.f32 %v378_v20, 0.0 }
 0x1ee   :  { %v418_v34 = vmax.f32 %v370_v25, 0.0 }
 0x1ef   :  { %v432_v35 = vpack.c.bf16 %v420_v32, %v419_v31 }
 0x1f0   :  { %v431_v36 = vpack.c.bf16 %v418_v34, %v417_v33  ;;  %v1232_v37 = vpop.f32.mrb[8].mxu1  ;;  %v1364_v34 = vld [vmem:[#allocation2 + $0x28] sm:$0xff]  }
 0x1f1   :  { %v391_v38 = vadd.f32 %v1232_v37, %v1076_v40  ;;  %v382_v39 = vpop.f32.mrb[9].mxu1  ;;  %1280 = vmatprep.subr.bf16.mxu1 %v1364_v34  ;;  %v1367_v37 = vld [vmem:[#allocation5] sm:$0xff]  }
 0x1f2   :  { %v383_v41 = vadd.f32 %v1076_v40, %v382_v39  ;;  %v1233_v42 = vpop.f32.mrb[10].mxu1  ;;  %1258 = vmatprep.mubr.bf16.mxu0 %v431_v36  ;;  %1281 = vmatpush3.bf16.msra.mxu1 %v1364_v34  ;;  %v1366_v36 = vld [vmem:[#allocation2 + $0x38] sm:$0xff]  }
 0x1f3   :  { %v394_v44 = vadd.f32 %v1233_v42, %v1076_v40  ;;  %v385_v47 = vpop.f32.mrb[11].mxu1  ;;  %1259 = vmatmul.mubr.bf16.gmra.mrb[20].mxu0 %v432_v35  ;;  %v423_v54 = vmax.f32 %v391_v38, 0.0  ;;  %v1365_v35 = vld [vmem:[#allocation2 + $0x30] sm:$0xff]   ;;  %v1368_v38 = vld [vmem:[#allocation5 + $0x8] sm:$0xff]   ;;  %1302 = vmatprep.subr.bf16.mxu0 %v1367_v37  ;;  %v1370_v39 = vld [vmem:[#allocation5 + $0x18] sm:$0xff]  }
 0x1f4   :  { %v386_v53 = vadd.f32 %v1076_v40, %v385_v47  ;;  %v421_v56 = vmax.f32 %v383_v41, 0.0  ;;  %1282 = vmatprep.subr.bf16.mxu1 %v1365_v35  ;;  %1303 = vmatpush3.bf16.msra.mxu0 %v1367_v37  ;;  %v1371_v41 = vld [vmem:[#allocation5 + $0x20] sm:$0xff]   ;;  %v1372_v42 = vld [vmem:[#allocation5 + $0x28] sm:$0xff]  }
 0x1f5   :  { %v424_v55 = vmax.f32 %v394_v44, 0.0  ;;  %1304 = vmatprep.subr.bf16.mxu0 %v1368_v38  ;;  %v1717_v44 = vld [vmem:[%s1873_s6 + $0x2] ss:$0 sm:$0xff] }
 0x1f6   :  { %v422_v58 = vmax.f32 %v386_v53, 0.0  ;;  %1283 = vmatpush3.bf16.msra.mxu1 %v1365_v35 }
 0x1f7   :  { %v434_v61 = vpack.c.bf16 %v424_v55, %v423_v54  ;;  %1284 = vmatprep.subr.bf16.mxu1 %v1366_v36 }
 0x1f8   :  { %v433_v3 = vpack.c.bf16 %v422_v58, %v421_v56  ;;  %v1236_v4 = vpop.f32.mrb[12].mxu1  ;;  %1305 = vmatpush3.bf16.msra.mxu0 %v1368_v38 }
 0x1f9   :  { %v407_v5 = vadd.f32 %v1236_v4, %v1076_v40  ;;  %v398_v6 = vpop.f32.mrb[13].mxu1 }
 0x1fa   :  { %v399_v8 = vadd.f32 %v1076_v40, %v398_v6  ;;  %v1237_v11 = vpop.f32.mrb[14].mxu1  ;;  %1262 = vmatprep.mubr.bf16.mxu0 %v433_v3  ;;  %1285 = vmatpush3.bf16.msra.mxu1 %v1366_v36 }
 0x1fb   :  { %v410_v17 = vadd.f32 %v1237_v11, %v1076_v40  ;;  %v401_v18 = vpop.f32.mrb[15].mxu1  ;;  %1263 = vmatmul.mubr.bf16.gmra.mrb[24].mxu0 %v434_v61  ;;  %v427_v20 = vmax.f32 %v407_v5, 0.0 }
 0x1fc   :  { %v402_v19 = vadd.f32 %v1076_v40, %v401_v18  ;;  %v425_v25 = vmax.f32 %v399_v8, 0.0  ;;  %v1369_v40 = vld [vmem:[#allocation5 + $0x10] sm:$0xff]  }
 0x1fd   :  { %v428_v22 = vmax.f32 %v410_v17, 0.0  ;;  %1306 = vmatprep.subr.bf16.mxu0 %v1369_v40 }
 0x1fe   :  { %v426_v31 = vmax.f32 %v402_v19, 0.0  ;;  %1307 = vmatpush3.bf16.msra.mxu0 %v1369_v40 }
 0x1ff   :  { %v436_v32 = vpack.c.bf16 %v428_v22, %v427_v20  ;;  %1308 = vmatprep.subr.bf16.mxu0 %v1370_v39 }
 0x200   :  { %v435_v33 = vpack.c.bf16 %v426_v31, %v425_v25 }
 0x202   :  { %1266 = vmatprep.mubr.bf16.mxu0 %v435_v33  ;;  %1309 = vmatpush3.bf16.msra.mxu0 %v1370_v39 }
 0x203   :  { %1267 = vmatmul.mubr.bf16.gmra.mrb[28].mxu0 %v436_v32  ;;  %1310 = vmatprep.subr.bf16.mxu0 %v1371_v41 }
 0x206   :  { %1311 = vmatpush3.bf16.msra.mxu0 %v1371_v41 }
 0x207   :  { %1312 = vmatprep.subr.bf16.mxu0 %v1372_v42 }
 0x20a   :  { %1313 = vmatpush3.bf16.msra.mxu0 %v1372_v42 }
 0x2be   :  { %v1256_v47 = vpop.f32.mrb[16].mxu0 }
 0x2bf   :  { %v549_v53 = vadd.f32 %v1256_v47, %v1717_v44  ;;  %v540_v54 = vpop.f32.mrb[17].mxu0 }
 0x2c0   :  { %v541_v55 = vadd.f32 %v1717_v44, %v540_v54  ;;  %v1257_v56 = vpop.f32.mrb[18].mxu0 }
 0x2c1   :  { %v552_v58 = vadd.f32 %v1257_v56, %v1717_v44  ;;  %v543_v61 = vpop.f32.mrb[19].mxu0  ;;  %v605_v5 = vmax.f32 %v549_v53, 0.0 }
 0x2c2   :  { %v603_v3 = vmax.f32 %v541_v55, 0.0  ;;  %v544_v4 = vadd.f32 %v1717_v44, %v543_v61 }
 0x2c3   :  { %v606_v6 = vmax.f32 %v552_v58, 0.0  ;;  %v1737_v20 = vadd.f32 %v605_v5, %v225_v52 }
 0x2c4   :  { %v604_v8 = vmax.f32 %v544_v4, 0.0  ;;  %v1729_v17 = vadd.f32 %v603_v3, %v223_v50 }
 0x2c5   :  { %v1725_v11 = vadd.f32 %v606_v6, %v226_v49 }
 0x2c6   :  { %v1733_v18 = vadd.f32 %v604_v8, %v224_v51  ;;  %v1260_v19 = vpop.f32.mrb[20].mxu0 }
 0x2c7   :  { %v565_v22 = vadd.f32 %v1260_v19, %v1717_v44  ;;  %v556_v25 = vpop.f32.mrb[21].mxu0  ;;  %v636_v50 = vpack.c.bf16 %v1725_v11, %v1737_v20 }
 0x2c8   :  { %v557_v46 = vadd.f32 %v1717_v44, %v556_v25  ;;  %v1261_v49 = vpop.f32.mrb[22].mxu0  ;;  %v635_v43 = vpack.c.bf16 %v1733_v18, %v1729_v17 }
 0x2c9   :  { %v568_v48 = vadd.f32 %v1261_v49, %v1717_v44  ;;  %v559_v51 = vpop.f32.mrb[23].mxu0  ;;  %v609_v52 = vmax.f32 %v565_v22, 0.0 }
 0x2ca   :  { %v607_v31 = vmax.f32 %v557_v46, 0.0  ;;  %v560_v45 = vadd.f32 %v1717_v44, %v559_v51  ;;  %1286 = vmatprep.mubr.bf16.mxu1 %v635_v43 }
 0x2cb   :  { %v610_v32 = vmax.f32 %v568_v48, 0.0  ;;  %1287 = vmatmul.mubr.bf16.vlgmr.msra.gmra.mrb[16].mxu1 %v636_v50  ;;  %v1761_v38 = vadd.f32 %v609_v52, %v229_v2 }
 0x2cc   :  { %v608_v33 = vmax.f32 %v560_v45, 0.0  ;;  %v1753_v35 = vadd.f32 %v607_v31, %v227_v0 }
 0x2cd   :  { %v1749_v34 = vadd.f32 %v610_v32, %v230_v63 }
 0x2ce   :  { %v1757_v36 = vadd.f32 %v608_v33, %v228_v1  ;;  %v1264_v37 = vpop.f32.mrb[24].mxu0 }
 0x2cf   :  { %v581_v40 = vadd.f32 %v1264_v37, %v1717_v44  ;;  %v572_v39 = vpop.f32.mrb[25].mxu0  ;;  %v638_v62 = vpack.c.bf16 %v1749_v34, %v1761_v38 }
 0x2d0   :  { %v573_v60 = vadd.f32 %v1717_v44, %v572_v39  ;;  %v1265_v63 = vpop.f32.mrb[26].mxu0  ;;  %v637_v57 = vpack.c.bf16 %v1757_v36, %v1753_v35 }
 0x2d1   :  { %v584_v0 = vadd.f32 %v1265_v63, %v1717_v44  ;;  %v575_v41 = vpop.f32.mrb[27].mxu0  ;;  %v613_v2 = vmax.f32 %v581_v40, 0.0 }
 0x2d2   :  { %v611_v1 = vmax.f32 %v573_v60, 0.0  ;;  %v576_v59 = vadd.f32 %v1717_v44, %v575_v41  ;;  %1290 = vmatprep.mubr.bf16.mxu1 %v637_v57 }
 0x2d3   :  { %v614_v42 = vmax.f32 %v584_v0, 0.0  ;;  %1291 = vmatmul.mubr.bf16.gmra.mrb[20].mxu1 %v638_v62  ;;  %v1785_v58 = vadd.f32 %v613_v2, %v233_v16 }
 0x2d4   :  { %v612_v47 = vmax.f32 %v576_v59, 0.0  ;;  %v1777_v54 = vadd.f32 %v611_v1, %v231_v14 }
 0x2d5   :  { %v1773_v53 = vadd.f32 %v614_v42, %v234_v13 }
 0x2d6   :  { %v1781_v55 = vadd.f32 %v612_v47, %v232_v15  ;;  %v1268_v56 = vpop.f32.mrb[28].mxu0 }
 0x2d7   :  { %v597_v61 = vadd.f32 %v1268_v56, %v1717_v44  ;;  %v588_v3 = vpop.f32.mrb[29].mxu0  ;;  %v640_v12 = vpack.c.bf16 %v1773_v53, %v1785_v58 }
 0x2d8   :  { %v589_v10 = vadd.f32 %v1717_v44, %v588_v3  ;;  %v1269_v13 = vpop.f32.mrb[30].mxu0  ;;  %v639_v7 = vpack.c.bf16 %v1781_v55, %v1777_v54 }
 0x2d9   :  { %v600_v14 = vadd.f32 %v1269_v13, %v1717_v44  ;;  %v591_v4 = vpop.f32.mrb[31].mxu0  ;;  %v617_v16 = vmax.f32 %v597_v61, 0.0 }
 0x2da   :  { %v615_v15 = vmax.f32 %v589_v10, 0.0  ;;  %v592_v9 = vadd.f32 %v1717_v44, %v591_v4  ;;  %1294 = vmatprep.mubr.bf16.mxu1 %v639_v7 }
 0x2db   :  { %v618_v5 = vmax.f32 %v600_v14, 0.0  ;;  %1295 = vmatmul.mubr.bf16.gmra.mrb[24].mxu1 %v640_v12  ;;  %v1809_v44 = vadd.f32 %v617_v16, %v237_v30 }
 0x2dc   :  { %v616_v6 = vmax.f32 %v592_v9, 0.0  ;;  %v1801_v19 = vadd.f32 %v615_v15, %v235_v28 }
 0x2dd   :  { %v1797_v8 = vadd.f32 %v618_v5, %v238_v27  ;;  %v1373_v27 = vld [vmem:[#allocation5 + $0x30] sm:$0xff]  }
 0x2de   :  { %v1805_v22 = vadd.f32 %v616_v6, %v236_v29  ;;  %1314 = vmatprep.subr.bf16.mxu0 %v1373_v27 }
 0x2df   :  { %v642_v24 = vpack.c.bf16 %v1797_v8, %v1809_v44  ;;  %1315 = vmatpush3.bf16.msra.mxu0 %v1373_v27 }
 0x2e0   :  { %v641_v25 = vpack.c.bf16 %v1805_v22, %v1801_v19  ;;  %1316 = vmatprep.subr.bf16.mxu0 %v1374_v21 }
 0x2e2   :  { %1298 = vmatprep.mubr.bf16.mxu1 %v641_v25 }
 0x2e3   :  { %1299 = vmatmul.mubr.bf16.gmra.mrb[28].mxu1 %v642_v24  ;;  %1317 = vmatpush3.bf16.msra.mxu0 %v1374_v21 }
 0x39e   :  { %v1288_v26 = vpop.f32.mrb[16].mxu1 }
 0x39f   :  { %v755_v28 = vadd.f32 %v1288_v26, %v1094_v23  ;;  %v746_v29 = vpop.f32.mrb[17].mxu1 }
 0x3a0   :  { %v747_v30 = vadd.f32 %v1094_v23, %v746_v29  ;;  %v1289_v46 = vpop.f32.mrb[18].mxu1 }
 0x3a1   :  { %v758_v49 = vadd.f32 %v1289_v46, %v1094_v23  ;;  %v749_v43 = vpop.f32.mrb[19].mxu1  ;;  %v811_v48 = vmax.f32 %v755_v28, 0.0 }
 0x3a2   :  { %v750_v50 = vadd.f32 %v1094_v23, %v749_v43  ;;  %v809_v31 = vmax.f32 %v747_v30, 0.0 }
 0x3a3   :  { %v812_v51 = vmax.f32 %v758_v49, 0.0 }
 0x3a4   :  { %v810_v45 = vmax.f32 %v750_v50, 0.0 }
 0x3a5   :  { %v826_v52 = vpack.c.bf16 %v812_v51, %v811_v48  ;;  %v1821_v51 = vld [vmem:[%s1873_s6 + $0x4] ss:$0 sm:$0xff]  ;;  %s1451_s6 = smov [#allocation7]  }
 0x3a6   :  { %v825_v32 = vpack.c.bf16 %v810_v45, %v809_v31  ;;  %v1292_v33 = vpop.f32.mrb[20].mxu1  ;;  %s1052_s24 = sshll.u32 %s1451_s6, 4  ;;  %s1053_s24 = int_to_ptr.vmem [resolvable:$true] %s1052_s24 }
 0x3a7   :  { %v771_v37 = vadd.f32 %v1292_v33, %v1094_v23  ;;  %v762_v40 = vpop.f32.mrb[21].mxu1  ;;  %s1419_s4 = scalar_lea.vmem %s1053_s24, 2048  ;;  %p1424_p3 = scmp.lt.s32.totalorder %s1053_s24, %s1053_s24 }
 0x3a8   :  { %v763_v39 = vadd.f32 %v1094_v23, %v762_v40  ;;  %v1293_v60 = vpop.f32.mrb[22].mxu1  ;;  %1318 = vmatprep.mubr.bf16.mxu0 %v825_v32  ;;  %p1420_p2 = scmp.ne.s32.totalorder %s1053_s24, %s1419_s4  ;;  %p1425_p4 = scmp.lt.s32.totalorder %s1419_s4, %s1419_s4 }
 0x3a9   :  { %v774_v63 = vadd.f32 %v1293_v60, %v1094_v23  ;;  %v765_v57 = vpop.f32.mrb[23].mxu1  ;;  %1319 = vmatmul.mubr.bf16.vlgmr.msra.gmra.mrb[32].mxu0 %v826_v52  ;;  %v815_v41 = vmax.f32 %v771_v37, 0.0 }
 0x3aa   :  { %v766_v0 = vadd.f32 %v1094_v23, %v765_v57  ;;  %v813_v1 = vmax.f32 %v763_v39, 0.0  ;;  %p1426_p5 = por %p1425_p4, %p1424_p3 }
 0x3ab   :  { %v816_v62 = vmax.f32 %v774_v63, 0.0 }
 0x3ac   :  { %v814_v59 = vmax.f32 %v766_v0, 0.0  ;;  %p1427_p6 = pnand %p1426_p5, %p1420_p2 }
 0x3ad   :  { %v828_v2 = vpack.c.bf16 %v816_v62, %v815_v41 }
 0x3ae   :  { %v827_v42 = vpack.c.bf16 %v814_v59, %v813_v1  ;;  %v1296_v47 = vpop.f32.mrb[24].mxu1 }
 0x3af   :  { %v787_v56 = vadd.f32 %v1296_v47, %v1094_v23  ;;  %v778_v61 = vpop.f32.mrb[25].mxu1 }
 0x3b0   :  { %v779_v3 = vadd.f32 %v1094_v23, %v778_v61  ;;  %v1297_v10 = vpop.f32.mrb[26].mxu1  ;;  %1322 = vmatprep.mubr.bf16.mxu0 %v827_v42 }
 0x3b1   :  { %v790_v13 = vadd.f32 %v1297_v10, %v1094_v23  ;;  %v781_v7 = vpop.f32.mrb[27].mxu1  ;;  %1323 = vmatmul.mubr.bf16.gmra.mrb[36].mxu0 %v828_v2  ;;  %v819_v4 = vmax.f32 %v787_v56, 0.0 }
 0x3b2   :  { %v782_v14 = vadd.f32 %v1094_v23, %v781_v7  ;;  %v817_v15 = vmax.f32 %v779_v3, 0.0 }
 0x3b3   :  { %v820_v12 = vmax.f32 %v790_v13, 0.0 }
 0x3b4   :  { %v818_v9 = vmax.f32 %v782_v14, 0.0 }
 0x3b5   :  { %v830_v16 = vpack.c.bf16 %v820_v12, %v819_v4 }
 0x3b6   :  { %v829_v5 = vpack.c.bf16 %v818_v9, %v817_v15  ;;  %v1300_v6 = vpop.f32.mrb[28].mxu1 }
 0x3b7   :  { %v803_v25 = vadd.f32 %v1300_v6, %v1094_v23  ;;  %v794_v24 = vpop.f32.mrb[29].mxu1 }
 0x3b8   :  { %v795_v27 = vadd.f32 %v1094_v23, %v794_v24  ;;  %v1301_v21 = vpop.f32.mrb[30].mxu1  ;;  %1326 = vmatprep.mubr.bf16.mxu0 %v829_v5 }
 0x3b9   :  { %v806_v26 = vadd.f32 %v1301_v21, %v1094_v23  ;;  %v797_v28 = vpop.f32.mrb[31].mxu1  ;;  %1327 = vmatmul.mubr.bf16.gmra.mrb[40].mxu0 %v830_v16  ;;  %v823_v30 = vmax.f32 %v803_v25, 0.0 }
 0x3ba   :  { %v798_v29 = vadd.f32 %v1094_v23, %v797_v28  ;;  %v821_v49 = vmax.f32 %v795_v27, 0.0 }
 0x3bb   :  { %v824_v46 = vmax.f32 %v806_v26, 0.0 }
 0x3bc   :  { %v822_v43 = vmax.f32 %v798_v29, 0.0 }
 0x3bd   :  { %v832_v50 = vpack.c.bf16 %v824_v46, %v823_v30 }
 0x3be   :  { %v831_v48 = vpack.c.bf16 %v822_v43, %v821_v49 }
 0x3c0   :  { %1330 = vmatprep.mubr.bf16.mxu0 %v831_v48 }
 0x3c1   :  { %1331 = vmatmul.mubr.bf16.gmra.mrb[44].mxu0 %v832_v50 }
 0x47c   :  { %v1320_v31 = vpop.f32.mrb[32].mxu0 }
 0x47d   :  { %v945_v45 = vadd.f32 %v1320_v31, %v1821_v51  ;;  %v936_v52 = vpop.f32.mrb[33].mxu0 }
 0x47e   :  { %v937_v32 = vadd.f32 %v1821_v51, %v936_v52  ;;  %v1321_v23 = vpop.f32.mrb[34].mxu0 }
 0x47f   :  { %v1001_v33 = vmax.f32 %v945_v45, 0.0  ;;  %v948_v37 = vadd.f32 %v1321_v23, %v1821_v51  ;;  %v939_v40 = vpop.f32.mrb[35].mxu0 }
 0x480   :  { %v999_v39 = vmax.f32 %v937_v32, 0.0  ;;  %v940_v60 = vadd.f32 %v1821_v51, %v939_v40 }
 0x481   :  { %v1017_v63 = vadd.f32 %v1001_v33, %v1737_v20  ;;  %v1002_v57 = vmax.f32 %v948_v37, 0.0 }
 0x482   :  { %v1015_v0 = vadd.f32 %v999_v39, %v1729_v17  ;;  %v1000_v41 = vmax.f32 %v940_v60, 0.0 }
 0x483   :  { %1033 = vst [vmem:[#allocation7 + $0x10] sm:$0xff] %v1017_v63  ;;  %v1018_v62 = vadd.f32 %v1002_v57, %v1725_v11 }
 0x484   :  { %1031 = vst [vmem:[#allocation7] sm:$0xff] %v1015_v0  ;;  %v1016_v1 = vadd.f32 %v1000_v41, %v1733_v18  ;;  %v1324_v59 = vpop.f32.mrb[36].mxu0 }
 0x485   :  { %1034 = vst [vmem:[#allocation7 + $0x18] sm:$0xff] %v1018_v62  ;;  %v961_v2 = vadd.f32 %v1324_v59, %v1821_v51  ;;  %v952_v42 = vpop.f32.mrb[37].mxu0 }
 0x486   :  { %1032 = vst [vmem:[#allocation7 + $0x8] sm:$0xff] %v1016_v1  ;;  %v953_v47 = vadd.f32 %v1821_v51, %v952_v42  ;;  %v1325_v56 = vpop.f32.mrb[38].mxu0 }
 0x487   :  { %v1005_v20 = vmax.f32 %v961_v2, 0.0  ;;  %v964_v61 = vadd.f32 %v1325_v56, %v1821_v51  ;;  %v955_v17 = vpop.f32.mrb[39].mxu0 }
 0x488   :  { %v1003_v3 = vmax.f32 %v953_v47, 0.0  ;;  %v956_v10 = vadd.f32 %v1821_v51, %v955_v17 }
 0x489   :  { %v1021_v11 = vadd.f32 %v1005_v20, %v1761_v38  ;;  %v1006_v13 = vmax.f32 %v964_v61, 0.0 }
 0x48a   :  { %v1019_v18 = vadd.f32 %v1003_v3, %v1753_v35  ;;  %v1004_v7 = vmax.f32 %v956_v10, 0.0 }
 0x48b   :  { %1037 = vst [vmem:[#allocation7 + $0x30] sm:$0xff] %v1021_v11  ;;  %v1022_v14 = vadd.f32 %v1006_v13, %v1749_v34 }
 0x48c   :  { %1035 = vst [vmem:[#allocation7 + $0x20] sm:$0xff] %v1019_v18  ;;  %v1020_v4 = vadd.f32 %v1004_v7, %v1757_v36  ;;  %v1328_v12 = vpop.f32.mrb[40].mxu0 }
 0x48d   :  { %1038 = vst [vmem:[#allocation7 + $0x38] sm:$0xff] %v1022_v14  ;;  %v977_v15 = vadd.f32 %v1328_v12, %v1821_v51  ;;  %v968_v9 = vpop.f32.mrb[41].mxu0 }
 0x48e   :  { %1036 = vst [vmem:[#allocation7 + $0x28] sm:$0xff] %v1020_v4  ;;  %v969_v16 = vadd.f32 %v1821_v51, %v968_v9  ;;  %v1329_v5 = vpop.f32.mrb[42].mxu0 }
 0x48f   :  { %v1009_v38 = vmax.f32 %v977_v15, 0.0  ;;  %v980_v6 = vadd.f32 %v1329_v5, %v1821_v51  ;;  %v971_v35 = vpop.f32.mrb[43].mxu0 }
 0x490   :  { %v1007_v25 = vmax.f32 %v969_v16, 0.0  ;;  %v972_v24 = vadd.f32 %v1821_v51, %v971_v35 }
 0x491   :  { %v1025_v34 = vadd.f32 %v1009_v38, %v1785_v58  ;;  %v1010_v27 = vmax.f32 %v980_v6, 0.0 }
 0x492   :  { %v1023_v36 = vadd.f32 %v1007_v25, %v1777_v54  ;;  %v1008_v21 = vmax.f32 %v972_v24, 0.0 }
 0x493   :  { %1041 = vst [vmem:[#allocation7 + $0x50] sm:$0xff] %v1025_v34  ;;  %v1026_v26 = vadd.f32 %v1010_v27, %v1773_v53 }
 0x494   :  { %1039 = vst [vmem:[#allocation7 + $0x40] sm:$0xff] %v1023_v36  ;;  %v1024_v28 = vadd.f32 %v1008_v21, %v1781_v55  ;;  %v1332_v29 = vpop.f32.mrb[44].mxu0 }
 0x495   :  { %1042 = vst [vmem:[#allocation7 + $0x58] sm:$0xff] %v1026_v26  ;;  %v993_v30 = vadd.f32 %v1332_v29, %v1821_v51  ;;  %v984_v46 = vpop.f32.mrb[45].mxu0 }
 0x496   :  { %1040 = vst [vmem:[#allocation7 + $0x48] sm:$0xff] %v1024_v28  ;;  %v985_v49 = vadd.f32 %v1821_v51, %v984_v46  ;;  %v1333_v43 = vpop.f32.mrb[46].mxu0 }
 0x497   :  { %v1013_v58 = vmax.f32 %v993_v30, 0.0  ;;  %v996_v50 = vadd.f32 %v1333_v43, %v1821_v51  ;;  %v987_v54 = vpop.f32.mrb[47].mxu0 }
 0x498   :  { %v1011_v48 = vmax.f32 %v985_v49, 0.0  ;;  %v988_v31 = vadd.f32 %v1821_v51, %v987_v54 }
 0x499   :  { %v1029_v53 = vadd.f32 %v1013_v58, %v1809_v44  ;;  %v1014_v55 = vmax.f32 %v996_v50, 0.0 }
 0x49a   :  { %v1027_v45 = vadd.f32 %v1011_v48, %v1801_v19  ;;  %v1012_v52 = vmax.f32 %v988_v31, 0.0 }
 0x49b   :  { %1045 = vst [vmem:[#allocation7 + $0x70] sm:$0xff] %v1029_v53  ;;  %v1030_v32 = vadd.f32 %v1014_v55, %v1797_v8 }
 0x49c   :  { %1043 = vst [vmem:[#allocation7 + $0x60] sm:$0xff] %v1027_v45  ;;  %v1028_v23 = vadd.f32 %v1012_v52, %v1805_v22 }
 0x49d   :  { %1046 = vst [vmem:[#allocation7 + $0x78] sm:$0xff] %v1030_v32 }
 0x49e   :  { %1044 = vst [vmem:[#allocation7 + $0x68] sm:$0xff] %v1028_v23 }
 0x49f   :  { %1430 = shalt.err (!%p1427_p6)
}
 0x4a0   :  { %s1431_s26 = scalar_lea.hbm %s1874_s7, 2048 }
 0x4a1   :  { %p1432_p7 = scmp.ne.s32.totalorder %s1874_s7, %s1431_s26  ;;  %p1435_p8 = scmp.lt.u32.totalorder %s1431_s26, %s1874_s7 }
 0x4a3   :  { %p1437_p9 = pnand %p1435_p8, %p1432_p7 }
 0x4a5   :  { %1440 = shalt.err (!%p1437_p9)
}
 0x4a6   :  { %s1452_s2 = smov 128   ;;  %s1453_s8 = smov 8  }
 0x4a7   :  { %1058 = dma.vmem_to_hbm [thread:$0]  %s1053_s24, 2048, %s1874_s7, [#allocation4], %s1452_s2, %s1452_s2, %s1453_s8  }
 0x4a8   :  { %1445 = dma.done.wait [#allocation4], 2048  }
 0x4a9   :  { %1446 = vsyncadd [#allocation4], 4294965248 }
 0x4aa   :  { %1062 = vsyncpa [#allocation3], 1 }
 0x4ab   :  { %1063 = vsyncpa [#allocation6], 1 }
 0x4ac   :  { %1064 = vsyncpa [#allocation4], 1 }

</bundles_post_ra>
